<compile_context>
chip_gen: v6e
topology: v6e:2x2x1
jax: 0.10.0
libtpu: 0.0.40
codegen_flags: <defaults>
</compile_context>

<pallas_src>
import functools
import math

import jax
import jax.numpy as jnp
from jax.experimental import pallas as pl
from jax.experimental.pallas import tpu as pltpu


# q @ k^T with the transpose folded into the MXU feed (no explicit .T / XLU pass).
_TRANS_B_DIMS = (((1,), (1,)), ((), ()))


def _norm_qkv_kernel(x_ref, scale_ref, shift_ref, wqkv_ref, bqkv_ref,
                     q_ref, k_ref, v_ref, *, channels):
    """GroupNorm affine apply + fused QKV projection for one (batch, token-tile)."""
    c = channels
    x = x_ref[0]                                              # (TL, C) f32, token-major
    xn = (x * scale_ref[0] + shift_ref[0]).astype(jnp.bfloat16)
    qkv = jnp.dot(xn, wqkv_ref[...],                          # (TL, 3C): bf16 in, f32 acc
                  preferred_element_type=jnp.float32)
    qkv = (qkv + bqkv_ref[...]).astype(jnp.bfloat16)
    q_ref[0] = qkv[:, 0 * c:1 * c]
    k_ref[0] = qkv[:, 1 * c:2 * c]
    v_ref[0] = qkv[:, 2 * c:3 * c]


def _flash_attn_kernel(q_ref, k_ref, v_ref, wo_ref, bo_ref, o_ref,
                       m_sc, l_sc, acc_sc, *, sm_scale):
    """Online-softmax attention over KV tiles; output projection fused at the last KV step."""
    ki = pl.program_id(2)

    @pl.when(ki == 0)
    def _init():
        m_sc[...] = jnp.full_like(m_sc[...], -jnp.inf)
        l_sc[...] = jnp.zeros_like(l_sc[...])
        acc_sc[...] = jnp.zeros_like(acc_sc[...])

    q = q_ref[0]                                              # (TQ, C) bf16
    k = k_ref[0]                                              # (TK, C) bf16
    s = jax.lax.dot_general(q, k, _TRANS_B_DIMS,
                            preferred_element_type=jnp.float32) * sm_scale  # (TQ, TK) f32

    m_prev = m_sc[...]                                        # (TQ, 1) f32
    m_new = jnp.maximum(m_prev, jnp.max(s, axis=-1, keepdims=True))
    alpha = jnp.exp(m_prev - m_new)                           # softmax math stays f32
    p = jnp.exp(s - m_new)
    l_sc[...] = alpha * l_sc[...] + jnp.sum(p, axis=-1, keepdims=True)
    acc_sc[...] = alpha * acc_sc[...] + jnp.dot(
        p.astype(jnp.bfloat16), v_ref[0], preferred_element_type=jnp.float32)
    m_sc[...] = m_new

    @pl.when(ki == pl.num_programs(2) - 1)
    def _finalize():
        inv_l = pl.reciprocal(l_sc[...], approx=True)         # EUP slot, ~free
        attn = (acc_sc[...] * inv_l).astype(jnp.bfloat16)     # (TQ, C)
        out = jnp.dot(attn, wo_ref[...], preferred_element_type=jnp.float32)
        o_ref[0] = out + bo_ref[...]


def _pick_tile(dim, target, align):
    """Largest multiple of `align` that divides `dim` and is <= target (else full `dim`)."""
    if dim <= target:
        return dim
    t = (min(target, dim) // align) * align
    while t >= align:
        if dim % t == 0:
            return t
        t -= align
    return dim


def _vmem_limit(estimate_bytes):
    # Explicit scoped-VMEM budget: >= the v6e default, never above v7x physical VMEM.
    return int(min(max(2 * estimate_bytes, 32 * 1024 * 1024), 64 * 1024 * 1024))


def vae_attention_block(x_nchw, params, *, num_groups=32, eps=1e-5,
                        l_tile=512, q_tile=256, kv_tile=512):
    N, C, H, W = x_nchw.shape
    L = H * W

    x_f32 = x_nchw.astype(jnp.float32)
    x_ncl = x_f32.reshape(N, C, L)

    # ---- pass 0: GroupNorm statistics (memory-bound, plain XLA reduction) ----
    cpg = C // num_groups
    xg = x_ncl.reshape(N, num_groups, cpg * L)
    mu = jnp.mean(xg, axis=-1)                                 # (N, G)
    var = jnp.mean(jnp.square(xg - mu[..., None]), axis=-1)    # (N, G)
    rstd = jax.lax.rsqrt(var + eps)
    mu_c = jnp.repeat(mu, cpg, axis=1)                         # (N, C)
    rstd_c = jnp.repeat(rstd, cpg, axis=1)                     # (N, C)
    gamma = params["gamma"].astype(jnp.float32)
    beta = params["beta"].astype(jnp.float32)
    scale = (rstd_c * gamma[None, :]).reshape(N, 1, C)
    shift = (beta[None, :] - mu_c * rstd_c * gamma[None, :]).reshape(N, 1, C)

    # Token-major layout once in XLA (avoids per-tile XLU transposes in the kernels).
    x_nlc = x_ncl.transpose(0, 2, 1)                           # (N, L, C)

    # ---- weights: fused QKV, bf16 operands (f32 accumulation on the MXU) ----
    w_qkv = params["w_in"].astype(jnp.float32).T.astype(jnp.bfloat16)     # (C, 3C)
    b_qkv = params["b_in"].astype(jnp.float32).reshape(1, 3 * C)
    w_o = params["w_out"].astype(jnp.float32).T.astype(jnp.bfloat16)      # (C, C)
    b_o = params["b_out"].astype(jnp.float32).reshape(1, C)

    tl = _pick_tile(L, l_tile, 128)
    tq = _pick_tile(L, q_tile, 128)
    tk = _pick_tile(L, kv_tile, 128)

    # ---- kernel 1: GroupNorm apply + fused QKV projection ----
    vmem1 = _vmem_limit(
        2 * tl * C * 4              # x tile (f32), double-buffered
        + 2 * 2 * C * 4             # scale/shift
        + 2 * (C * 3 * C) * 2       # w_qkv (bf16)
        + 2 * 3 * C * 4             # b_qkv
        + 2 * 3 * tl * C * 2        # q/k/v output tiles (bf16)
        + tl * 3 * C * 6)           # in-kernel temporaries
    q, k, v = pl.pallas_call(
        functools.partial(_norm_qkv_kernel, channels=C),
        out_shape=tuple(jax.ShapeDtypeStruct((N, L, C), jnp.bfloat16) for _ in range(3)),
        grid_spec=pltpu.PrefetchScalarGridSpec(
            num_scalar_prefetch=0,
            grid=(N, L // tl),
            in_specs=[
                pl.BlockSpec((1, tl, C), lambda n, li: (n, li, 0)),   # x (token-major)
                pl.BlockSpec((1, 1, C), lambda n, li: (n, 0, 0)),     # scale
                pl.BlockSpec((1, 1, C), lambda n, li: (n, 0, 0)),     # shift
                pl.BlockSpec((C, 3 * C), lambda n, li: (0, 0)),       # w_qkv (constant block)
                pl.BlockSpec((1, 3 * C), lambda n, li: (0, 0)),       # b_qkv
            ],
            out_specs=[
                pl.BlockSpec((1, tl, C), lambda n, li: (n, li, 0)),
                pl.BlockSpec((1, tl, C), lambda n, li: (n, li, 0)),
                pl.BlockSpec((1, tl, C), lambda n, li: (n, li, 0)),
            ],
        ),
        compiler_params=pltpu.CompilerParams(
            dimension_semantics=("parallel", "parallel"),
            vmem_limit_bytes=vmem1,
        ),
    )(x_nlc, scale, shift, w_qkv, b_qkv)

    # ---- kernel 2: flash-style attention + fused output projection ----
    vmem2 = _vmem_limit(
        2 * tq * C * 2              # q tiles (bf16)
        + 2 * 2 * tk * C * 2        # k/v tiles (bf16)
        + 2 * C * C * 2             # w_o (bf16)
        + 2 * C * 4                 # b_o
        + 2 * tq * C * 4            # output tile (f32)
        + tq * C * 4 + 2 * tq * 4   # scratch acc / m / l
        + 3 * tq * tk * 4)          # scores / p temporaries
    o = pl.pallas_call(
        functools.partial(_flash_attn_kernel, sm_scale=1.0 / math.sqrt(C)),
        out_shape=jax.ShapeDtypeStruct((N, L, C), jnp.float32),
        grid_spec=pltpu.PrefetchScalarGridSpec(
            num_scalar_prefetch=0,
            grid=(N, L // tq, L // tk),
            in_specs=[
                pl.BlockSpec((1, tq, C), lambda n, qi, ki: (n, qi, 0)),  # q
                pl.BlockSpec((1, tk, C), lambda n, qi, ki: (n, ki, 0)),  # k
                pl.BlockSpec((1, tk, C), lambda n, qi, ki: (n, ki, 0)),  # v
                pl.BlockSpec((C, C), lambda n, qi, ki: (0, 0)),          # w_o
                pl.BlockSpec((1, C), lambda n, qi, ki: (0, 0)),          # b_o
            ],
            out_specs=pl.BlockSpec((1, tq, C), lambda n, qi, ki: (n, qi, 0)),
            scratch_shapes=[
                pltpu.VMEM((tq, 1), jnp.float32),   # running max
                pltpu.VMEM((tq, 1), jnp.float32),   # running sum
                pltpu.VMEM((tq, C), jnp.float32),   # output accumulator
            ],
        ),
        compiler_params=pltpu.CompilerParams(
            dimension_semantics=("parallel", "parallel", "arbitrary"),
            vmem_limit_bytes=vmem2,
        ),
    )(q, k, v, w_o, b_o)

    # ---- epilogue: back to NCHW + residual add (single memory-bound XLA pass) ----
    return o.transpose(0, 2, 1).reshape(N, C, H, W) + x_f32


def vae_attention_block_ref(x_nchw, params, *, num_groups=32, eps=1e-5):
    """Pure-JAX reference mirroring the PyTorch forward."""
    N, C, H, W = x_nchw.shape
    L = H * W
    x = x_nchw.astype(jnp.float32)

    xg = x.reshape(N, num_groups, (C // num_groups) * L)
    mu = xg.mean(-1, keepdims=True)
    var = ((xg - mu) ** 2).mean(-1, keepdims=True)
    xn = (xg - mu) / jnp.sqrt(var + eps)
    xn = xn.reshape(N, C, H, W)
    xn = xn * params["gamma"][None, :, None, None] + params["beta"][None, :, None, None]

    seq = xn.reshape(N, C, L).transpose(0, 2, 1)                    # (N, L, C)
    qkv = seq @ params["w_in"].T + params["b_in"]
    q, k, v = jnp.split(qkv, 3, axis=-1)
    w = (q @ k.transpose(0, 2, 1)) / math.sqrt(C)
    w = jax.nn.softmax(w, axis=-1)
    o = w @ v
    o = o @ params["w_out"].T + params["b_out"]
    o = o.transpose(0, 2, 1).reshape(N, C, H, W)
    return o + x


if __name__ == "__main__":
    # Small shapes consistent with the module: channels must be divisible by 32.
    N, C, H, W = 2, 64, 8, 8

    key = jax.random.PRNGKey(0)
    kx, kg, kb, kwi, kbi, kwo, kbo = jax.random.split(key, 7)

    x = jax.random.normal(kx, (N, C, H, W), dtype=jnp.float32)

    params = {
        # GroupNorm affine (nontrivial deterministic values instead of ones/zeros)
        "gamma": 1.0 + 0.1 * jax.random.normal(kg, (C,), dtype=jnp.float32),
        "beta": 0.1 * jax.random.normal(kb, (C,), dtype=jnp.float32),
        # SelfAttention(1, C): in_proj Linear(C, 3C), out_proj Linear(C, C)
        "w_in": jax.random.normal(kwi, (3 * C, C), dtype=jnp.float32) / math.sqrt(C),
        "b_in": 0.1 * jax.random.normal(kbi, (3 * C,), dtype=jnp.float32),
        "w_out": jax.random.normal(kwo, (C, C), dtype=jnp.float32) / math.sqrt(C),
        "b_out": 0.1 * jax.random.normal(kbo, (C,), dtype=jnp.float32),
    }

    out = vae_attention_block(x, params)
    out = jax.block_until_ready(out)

    ref = vae_attention_block_ref(x, params)
    assert out.shape == (N, C, H, W)
    # bf16 MXU operands (f32 accumulation) -> slightly looser tolerance than pure f32.
    err = float(jnp.max(jnp.abs(out - ref)))
    assert jnp.allclose(out, ref, rtol=3e-2, atol=3e-2), err

    print("KERNEL_OK")
</pallas_src>

<mosaic_0001>
module attributes {stable_mosaic.version = 11 : i64} {
  func.func @_norm_qkv_kernel(%arg0: i32, %arg1: i32, %arg2: memref<1x64x64xf32, #tpu.memory_space<vmem>>, %arg3: memref<1x1x64xf32, #tpu.memory_space<vmem>>, %arg4: memref<1x1x64xf32, #tpu.memory_space<vmem>>, %arg5: memref<64x192xbf16, #tpu.memory_space<vmem>>, %arg6: memref<1x192xf32, #tpu.memory_space<vmem>>, %arg7: memref<1x64x64xbf16, #tpu.memory_space<vmem>>, %arg8: memref<1x64x64xbf16, #tpu.memory_space<vmem>>, %arg9: memref<1x64x64xbf16, #tpu.memory_space<vmem>>) attributes {dimension_semantics = [#tpu.dimension_semantics<parallel>, #tpu.dimension_semantics<parallel>], iteration_bounds = array<i64: 2, 1>, scalar_prefetch = 0 : i64, scratch_operands = 0 : i64, tpu.core_type = #tpu.core_type<tc>, window_params = [{transform_indices = @transform_0, window_bounds = array<i64: 1, 64, 64>}, {transform_indices = @transform_1, window_bounds = array<i64: 1, 1, 64>}, {transform_indices = @transform_2, window_bounds = array<i64: 1, 1, 64>}, {pipeline_mode = #tpu.pipeline_mode<synchronous>, transform_indices = @transform_3, window_bounds = array<i64: 64, 192>}, {pipeline_mode = #tpu.pipeline_mode<synchronous>, transform_indices = @transform_4, window_bounds = array<i64: 1, 192>}, {transform_indices = @transform_5, window_bounds = array<i64: 1, 64, 64>}, {transform_indices = @transform_6, window_bounds = array<i64: 1, 64, 64>}, {transform_indices = @transform_7, window_bounds = array<i64: 1, 64, 64>}]} {
    %c0 = arith.constant 0 : index
    %c0_0 = arith.constant 0 : index
    %c0_1 = arith.constant 0 : index
    %0 = vector.load %arg2[%c0, %c0_0, %c0_1] : memref<1x64x64xf32, #tpu.memory_space<vmem>>, vector<1x64x64xf32>
    %1 = vector.shape_cast %0 : vector<1x64x64xf32> to vector<64x64xf32>
    %c0_2 = arith.constant 0 : index
    %c0_3 = arith.constant 0 : index
    %c0_4 = arith.constant 0 : index
    %2 = vector.load %arg3[%c0_2, %c0_3, %c0_4] : memref<1x1x64xf32, #tpu.memory_space<vmem>>, vector<1x1x64xf32>
    %3 = vector.shape_cast %2 : vector<1x1x64xf32> to vector<1x64xf32>
    %4 = vector.broadcast %3 : vector<1x64xf32> to vector<64x64xf32>
    %5 = arith.mulf %1, %4 : vector<64x64xf32>
    %c0_5 = arith.constant 0 : index
    %c0_6 = arith.constant 0 : index
    %c0_7 = arith.constant 0 : index
    %6 = vector.load %arg4[%c0_5, %c0_6, %c0_7] : memref<1x1x64xf32, #tpu.memory_space<vmem>>, vector<1x1x64xf32>
    %7 = vector.shape_cast %6 : vector<1x1x64xf32> to vector<1x64xf32>
    %8 = vector.broadcast %7 : vector<1x64xf32> to vector<64x64xf32>
    %9 = arith.addf %5, %8 : vector<64x64xf32>
    %10 = arith.truncf %9 : vector<64x64xf32> to vector<64x64xbf16>
    %c0_8 = arith.constant 0 : index
    %c0_9 = arith.constant 0 : index
    %11 = vector.load %arg5[%c0_8, %c0_9] : memref<64x192xbf16, #tpu.memory_space<vmem>>, vector<64x192xbf16>
    %cst = arith.constant dense<0.000000e+00> : vector<64x192xf32>
    %12 = tpu.matmul %10, %11, %cst {dimension_numbers = #tpu.dot_dimension_numbers<[1], [0], [0], [1], [0, 0, 1, 1], [], []>} : vector<64x64xbf16>, vector<64x192xbf16>, vector<64x192xf32> -> vector<64x192xf32>
    %c0_10 = arith.constant 0 : index
    %c0_11 = arith.constant 0 : index
    %13 = vector.load %arg6[%c0_10, %c0_11] : memref<1x192xf32, #tpu.memory_space<vmem>>, vector<1x192xf32>
    %14 = vector.broadcast %13 : vector<1x192xf32> to vector<64x192xf32>
    %15 = arith.addf %12, %14 : vector<64x192xf32>
    %16 = arith.truncf %15 : vector<64x192xf32> to vector<64x192xbf16>
    %17 = vector.extract_strided_slice %16 {offsets = [0, 0], sizes = [64, 64], strides = [1, 1]} : vector<64x192xbf16> to vector<64x64xbf16>
    %c0_12 = arith.constant 0 : index
    %c0_13 = arith.constant 0 : index
    %c0_14 = arith.constant 0 : index
    %18 = vector.load %arg7[%c0_12, %c0_13, %c0_14] : memref<1x64x64xbf16, #tpu.memory_space<vmem>>, vector<1x64x64xbf16>
    %19 = vector.shape_cast %18 : vector<1x64x64xbf16> to vector<64x64xbf16>
    %20 = vector.shape_cast %17 : vector<64x64xbf16> to vector<1x64x64xbf16>
    tpu.vector_store %arg7[%c0_12, %c0_13, %c0_14], %20 {strides = array<i32>} : memref<1x64x64xbf16, #tpu.memory_space<vmem>>, vector<1x64x64xbf16>,
    %21 = vector.extract_strided_slice %16 {offsets = [0, 64], sizes = [64, 64], strides = [1, 1]} : vector<64x192xbf16> to vector<64x64xbf16>
    %c0_15 = arith.constant 0 : index
    %c0_16 = arith.constant 0 : index
    %c0_17 = arith.constant 0 : index
    %22 = vector.load %arg8[%c0_15, %c0_16, %c0_17] : memref<1x64x64xbf16, #tpu.memory_space<vmem>>, vector<1x64x64xbf16>
    %23 = vector.shape_cast %22 : vector<1x64x64xbf16> to vector<64x64xbf16>
    %24 = vector.shape_cast %21 : vector<64x64xbf16> to vector<1x64x64xbf16>
    tpu.vector_store %arg8[%c0_15, %c0_16, %c0_17], %24 {strides = array<i32>} : memref<1x64x64xbf16, #tpu.memory_space<vmem>>, vector<1x64x64xbf16>,
    %25 = vector.extract_strided_slice %16 {offsets = [0, 128], sizes = [64, 64], strides = [1, 1]} : vector<64x192xbf16> to vector<64x64xbf16>
    %c0_18 = arith.constant 0 : index
    %c0_19 = arith.constant 0 : index
    %c0_20 = arith.constant 0 : index
    %26 = vector.load %arg9[%c0_18, %c0_19, %c0_20] : memref<1x64x64xbf16, #tpu.memory_space<vmem>>, vector<1x64x64xbf16>
    %27 = vector.shape_cast %26 : vector<1x64x64xbf16> to vector<64x64xbf16>
    %28 = vector.shape_cast %25 : vector<64x64xbf16> to vector<1x64x64xbf16>
    tpu.vector_store %arg9[%c0_18, %c0_19, %c0_20], %28 {strides = array<i32>} : memref<1x64x64xbf16, #tpu.memory_space<vmem>>, vector<1x64x64xbf16>,
    return
  }
  func.func @transform_0(%arg0: i32, %arg1: i32) -> (i32, i32, i32) {
    %c0_i32 = arith.constant 0 : i32
    %c0_i32_0 = arith.constant 0 : i32
    return %arg0, %arg1, %c0_i32 : i32, i32, i32
  }
  func.func @transform_1(%arg0: i32, %arg1: i32) -> (i32, i32, i32) {
    %c0_i32 = arith.constant 0 : i32
    %c0_i32_0 = arith.constant 0 : i32
    %c0_i32_1 = arith.constant 0 : i32
    return %arg0, %c0_i32, %c0_i32_0 : i32, i32, i32
  }
  func.func @transform_2(%arg0: i32, %arg1: i32) -> (i32, i32, i32) {
    %c0_i32 = arith.constant 0 : i32
    %c0_i32_0 = arith.constant 0 : i32
    %c0_i32_1 = arith.constant 0 : i32
    return %arg0, %c0_i32, %c0_i32_0 : i32, i32, i32
  }
  func.func @transform_3(%arg0: i32, %arg1: i32) -> (i32, i32) {
    %c0_i32 = arith.constant 0 : i32
    %c0_i32_0 = arith.constant 0 : i32
    %c0_i32_1 = arith.constant 0 : i32
    return %c0_i32, %c0_i32_0 : i32, i32
  }
  func.func @transform_4(%arg0: i32, %arg1: i32) -> (i32, i32) {
    %c0_i32 = arith.constant 0 : i32
    %c0_i32_0 = arith.constant 0 : i32
    %c0_i32_1 = arith.constant 0 : i32
    return %c0_i32, %c0_i32_0 : i32, i32
  }
  func.func @transform_5(%arg0: i32, %arg1: i32) -> (i32, i32, i32) {
    %c0_i32 = arith.constant 0 : i32
    %c0_i32_0 = arith.constant 0 : i32
    return %arg0, %arg1, %c0_i32 : i32, i32, i32
  }
  func.func @transform_6(%arg0: i32, %arg1: i32) -> (i32, i32, i32) {
    %c0_i32 = arith.constant 0 : i32
    %c0_i32_0 = arith.constant 0 : i32
    return %arg0, %arg1, %c0_i32 : i32, i32, i32
  }
  func.func @transform_7(%arg0: i32, %arg1: i32) -> (i32, i32, i32) {
    %c0_i32 = arith.constant 0 : i32
    %c0_i32_0 = arith.constant 0 : i32
    return %arg0, %arg1, %c0_i32 : i32, i32, i32
  }
}

</mosaic_0001>

<bundles_post_ra>
// kernel: tpu_custom_call.1
= control target key start
LH: loop header
LB: loop body
LE: loop exit
PB: predicated region body
PF: predicated region fallthrough
CT: control target
= control target key end

     0   :  { %s1802_s0 = inlined_call_operand.hbm [shape: f32[2,64,64], index: 0, kind: input, shape index: {}]   ;;  %s1803_s1 = inlined_call_operand.hbm [shape: f32[2,1,64], index: 1, kind: input, shape index: {}]   ;;  %s1804_s2 = inlined_call_operand.vmem [shape: f32[2,1,64], index: 2, kind: input, shape index: {}]   ;;  %s1805_s3 = inlined_call_operand.hbm [shape: bf16[64,192], index: 3, kind: input, shape index: {}]   ;;  %s1806_s4 = inlined_call_operand.vmem [shape: f32[1,192], index: 4, kind: input, shape index: {}]   ;;  %s1807_s5 = inlined_call_operand.hbm [shape: bf16[2,64,64], index: 5, kind: output, shape index: {0}]   ;;  %s1808_s6 = inlined_call_operand.hbm [shape: bf16[2,64,64], index: 6, kind: output, shape index: {1}]   ;;  %s1809_s7 = inlined_call_operand.hbm [shape: bf16[2,64,64], index: 7, kind: output, shape index: {2}]  }
   0x1   :  { %1820 = sst [smem:[#allocation23_spill]] %s1802_s0 }
   0x2   :  { %1821 = sst [smem:[#allocation24_spill]] %s1805_s3 }
   0x3   :  { %1822 = sst [smem:[#allocation25_spill]] %s1809_s7 }
   0x4   :  { %13 = vsyncpa [#allocation3], 0 }
   0x5   :  { %15 = vsyncpa [#allocation3 + $0x1], 0 }
   0x6   :  { %16 = vsyncpa [#allocation6], 0 }
   0x7   :  { %18 = vsyncpa [#allocation6 + $0x1], 0 }
   0x8   :  { %19 = vsyncpa [#allocation4], 0 }
   0x9   :  { %21 = vsyncpa [#allocation4 + $0x1], 0 }
   0xa   :  { %22 = vsyncpa [#allocation10], 0 }
   0xb   :  { %24 = vsyncpa [#allocation10 + $0x1], 0  ;;  %s1427_s24 = smov 0   ;;  %s1429_s25 = smov 0  }
   0xc   :  { %s1431_s26 = smov 0   ;;  %s1433_s27 = smov 0  }
   0xd   :  { %s1435_s28 = smov 0   ;;  %s1437_s29 = smov 0  }
   0xe LB: > { %1823 = sst [smem:[#allocation17_spill]] %s1354_s24  ;;  %s1458_s30 = sadd.s32 4294967295, %s1374_s29   ;;  %s1374_s29 = sphi %s1437_s29, %s30_s29   ;;  %s1370_s28 = sphi %s1435_s28, %s1854_s28   ;;  %s1366_s27 = sphi %s1433_s27, %s1853_s27   ;;  %s1362_s26 = sphi %s1431_s26, %s1849_s26   ;;  %s1358_s25 = sphi %s1429_s25, %s1852_s25   ;;  %s1354_s24 = sphi %s1427_s24, %s1851_s24  }
   0xf   : > { %1824 = sst [smem:[#allocation18_spill]] %s1362_s26  ;;  %s1810_s8 = sadd.s32 4294967294, %s1374_s29  }
  0x10   : > { %1825 = sst [smem:[#allocation19_spill]] %s1374_s29  ;;  %p64_p0 = scmp.ne.s32.totalorder %s1358_s25, %s1354_s24 }
  0x11   : > { %p65_p1 = scmp.eq.s32.totalorder %s1458_s30, 0  ;;  %p190_p3 = scmp.eq.s32.totalorder %s1810_s8, 1 }
  0x12   : > { %p961_p5 = scmp.ge.s32.totalorder %s1374_s29, 1  ;;  %p253_p7 = scmp.lt.s32.totalorder %s1374_s29, 3 }
  0x13   : > { %p1469_p4 = por %p65_p1, %p64_p0  ;;  %p1474_p6 = por %p190_p3, %p64_p0 }
  0x14   : > { %p1479_p8 = pnand %p961_p5, %p253_p7  ;;  %s1376_s12 = smov [#allocation7]  }
  0x15   : > { %s1827_s10 = scalar_select %p1474_p6, 1, 0 }
  0x16   : > { %s265_s13 = sshll.u32 %s1376_s12, 4  ;;  %p1057_p9 = pneg %p1479_p8  ;;  %s266_s13 = int_to_ptr.vmem [resolvable:$true] %s265_s13 }
  0x17   : > { %1828 = sst [smem:[#allocation20_spill]] %s1827_s10  ;;  %p963_p10 = scmp.ge.s32.totalorder %s1374_s29, 2 }
  0x18   : > { %p1488_p11 = pnand %p1057_p9, %p65_p1  ;;  %s42_s15 = sadd.s32 1, %s1370_s28 }
  0x19   : > { %s1159_s16 = scalar_lea.vmem %s266_s13, 1024  ;;  %p1167_p5 = scmp.lt.s32.totalorder %s266_s13, %s266_s13 }
  0x1a   : > { %p1150_p12 = pneg %p1488_p11  ;;  %p1160_p13 = scmp.ne.s32.totalorder %s266_s13, %s1159_s16 }
  0x1b   : > { %p1168_p7 = scmp.lt.s32.totalorder %s1159_s16, %s1159_s16 }
  0x1c   : > { %p1162_p0 = pnand %p1160_p13, %p1150_p12 }
  0x1d   : > { %p1169_p2 = por %p1168_p7, %p1167_p5 }
  0x1e   : > { %p1163_p3 = pneg %p1162_p0 }
  0x20   : > { %p1170_p6 = pnand %p1169_p2, %p1163_p3 }
  0x22   : > { %1173 = shalt.err (!%p1170_p6)
}
  0x23   : > { %s1811_s17 = smov 128   ;;  %s1812_s18 = smov 8  }
  0x24   : > { %s1831_s3 = sld [smem:[#allocation24_spill]]  ;;  %p44_p2 = scmp.ge.s32.totalorder %s42_s15, 2 }
  0x25   : > { %s51_s21 = sadd.s32 1, %s1362_s26  ;;  %p58_p6 = scmp.ne.s32.totalorder %s1362_s26, %s1358_s25 }
  0x26   : > { %p59_p9 = scmp.eq.s32.totalorder %s1374_s29, 0  ;;  %s1856_s15 = smov (%p44_p2, %s42_s15), 0 }
  0x27   : > { %1832 = sst [smem:[#allocation21_spill]] %s1856_s15  ;;  %p1834_p13 = scmp.eq.s32.totalorder %s1458_s30, 1 }
  0x28   : > { %p1509_p12 = por %p59_p9, %p58_p6  ;;  %s46_s12 = ssub.s32 %s1370_s28, %s1856_s15 }
  0x29   : > { %p1515_p0 = por %p1834_p13, %p58_p6  ;;  %p49_p3 = scmp.eq.s32.totalorder %s46_s12, 0 }
  0x2a   : > { %1060 = dma.hbm_to_vmem [thread:$0]  (!%p1488_p11), %s1831_s3, 1024, %s266_s13, [#allocation6], %s1811_s17, %s1811_s17, %s1812_s18  }
  0x2b   : > { %p1079_p11 = scmp.lt.s32.totalorder %s1374_s29, 2  ;;  %s1523_s13 = sand.u32 1, %s1362_s26  }
  0x2c   : > { %s964_s14 = sshll.u32 %s1523_s13, 6  ;;  %s1015_s19 = sshll.u32 %s1370_s28, 10 }
  0x2d   : > { %s1527_s16 = scalar_select %p49_p3, %s1362_s26, %s51_s21  }
  0x2e   : > { %s1837_s0 = sld [smem:[#allocation23_spill]]  ;;  %s286_s18 = scalar_lea.vmem [#allocation2], %s964_s14 }
  0x2f   : > { %1836 = sst [smem:[#allocation22_spill]] %s1527_s16  ;;  %s295_s3 = sshll.u32 %s286_s18, 4  ;;  %s296_s3 = int_to_ptr.vmem [resolvable:$true] %s295_s3 }
  0x30   : > { %p1535_p5 = pnand %p1079_p11, %p1509_p12  ;;  %s305_s12 = sand.u32 1, %s1374_s29  }
  0x31   : > { %s283_s10 = scalar_lea.sflag [#allocation3], %s1523_s13  ;;  %s1187_s21 = scalar_lea.vmem %s296_s3, 1024 }
  0x32   : > { %p1176_p7 = pneg %p1535_p5  ;;  %p1188_p2 = scmp.ne.s32.totalorder %s296_s3, %s1187_s21 }
  0x33   : > { %s1379_s8 = smov [#allocation2]  }
  0x34   : > { %s294_s17 = scalar_lea.hbm %s1837_s0, %s1015_s19  ;;  %p1190_p6 = pnand %p1188_p2, %p1176_p7 }
  0x35   : > { %s1192_s18 = sshll.u32 %s1379_s8, 4  ;;  %s1193_s18 = int_to_ptr.vmem [resolvable:$false] %s1192_s18 }
  0x36   : > { %p1191_p9 = pneg %p1190_p6  ;;  %s1194_s22 = scalar_lea.vmem %s1193_s18, 2048 }
  0x37   : > { %p1195_p12 = scmp.lt.s32.totalorder %s296_s3, %s1193_s18  ;;  %p1196_p13 = scmp.lt.s32.totalorder %s1194_s22, %s1187_s21 }
  0x39   : > { %p1197_p11 = por %p1196_p13, %p1195_p12 }
  0x3b   : > { %p1198_p3 = pnand %p1197_p11, %p1191_p9 }
  0x3d   : > { %1201 = shalt.err (!%p1198_p3)
}
  0x3e   : > { %s1839_s14 = smov 8   ;;  %s1840_s19 = smov 128  }
  0x3f   : > { %1064 = dma.hbm_to_vmem [thread:$0]  (!%p1535_p5), %s294_s17, 1024, %s296_s3, %s283_s10, %s1840_s19, %s1840_s19, %s1839_s14  }
  0x40   : > { %s967_s20 = sshll.u32 %s1370_s28, 4  ;;  %s308_s0 = scalar_lea.vmem [#allocation5], %s1523_s13 }
  0x41   : > { %s315_s16 = sshll.u32 %s308_s0, 4  ;;  %s313_s18 = scalar_lea.hbm %s1803_s1, %s967_s20  ;;  %s316_s16 = int_to_ptr.vmem [resolvable:$true] %s315_s16 }
  0x42   : > { %s306_s21 = scalar_lea.sflag [#allocation6], %s305_s12  ;;  %s1215_s22 = scalar_lea.vmem %s316_s16, 16 }
  0x43   : > { %p1216_p2 = scmp.ne.s32.totalorder %s316_s16, %s1215_s22  ;;  %s1380_s29 = smov [#allocation5]  }
  0x44   : > { %s1220_s24 = sshll.u32 %s1380_s29, 4  ;;  %s1221_s24 = int_to_ptr.vmem [resolvable:$false] %s1220_s24 }
  0x45   : > { %p1218_p6 = pnand %p1216_p2, %p1176_p7  ;;  %s1222_s7 = scalar_lea.vmem %s1221_s24, 32 }
  0x46   : > { %p1223_p12 = scmp.lt.s32.totalorder %s316_s16, %s1221_s24  ;;  %p1224_p13 = scmp.lt.s32.totalorder %s1222_s7, %s1215_s22 }
  0x47   : > { %p1219_p9 = pneg %p1218_p6 }
  0x48   : > { %p1225_p11 = por %p1224_p13, %p1223_p12 }
  0x4a   : > { %p1226_p3 = pnand %p1225_p11, %p1219_p9 }
  0x4c   : > { %1229 = shalt.err (!%p1226_p3)
}
  0x4d   : > { %1067 = dma.hbm_to_vmem [thread:$0]  (!%p1535_p5), %s313_s18, 16, %s316_s16, %s306_s21  }
  0x4e   : > { %330 = sbr.rel (%p1479_p8) target bundleno = 479 (0x1df), region = 40  ;;  %s1564_s0 = sand.u32 (!%p1479_p8), 1, %s1358_s25  }
  0x4f   : > { %s969_s3 = sshll.u32 (!%p1479_p8), %s1564_s0, 6  ;;  %s333_s26 = scalar_lea.sflag (!%p1479_p8), [#allocation3], %s1564_s0 }
  0x50   : > { %s1568_s29 = scalar_lea.vmem (!%p1479_p8), [#allocation2], %s969_s3 }
  0x53   : > { %1333 = dma.done.wait (%p1469_p4), %s333_s26, 1024  }
  0x54   : > { %1335 = vsyncadd (%p1469_p4), %s333_s26, 4294966272  ;;  %s341_s7 = sand.u32 1, %s1458_s30   ;;  %s344_s10 = scalar_lea.vmem [#allocation5], %s1564_s0 }
  0x55   : > { %s342_s24 = scalar_lea.sflag [#allocation6], %s341_s7 }
  0x56   : > { %1337 = dma.done.wait (%p1469_p4), %s342_s24, 16  }
  0x57   : > { %1339 = vsyncadd (%p1469_p4), %s342_s24, 4294967280 }
  0x58   : > { %1341 = dma.done.wait (%p65_p1), [#allocation6], 1024  }
  0x59   : > { %1343 = vsyncadd (%p65_p1), [#allocation6], 4294966272  ;;  %v1381_v0 = vmov 0   ;;  %p397_p8 = scmp.lt.s32.totalorder %s1366_s27, 1  ;;  %v1136_v1 = vld [vmem:[#allocation7 + $0x34] ss:$8 sps:$4 sm:$0xff]   ;;  %v456_v39 = vlaneseq }
  0x5a   : > { %551 = vmatprep.mubr.bf16.mxu0 %v1381_v0  ;;  %571 = vmatprep.mubr.bf16.mxu1 %v1381_v0  ;;  %v1138_v2 = vld [vmem:[#allocation7 + $0x30] ss:$8 sps:$4 sm:$0xff]   ;;  %v1139_v3 = vld [vmem:[#allocation7 + $0x24] ss:$8 sps:$4 sm:$0xff]   ;;  %v1141_v4 = vld [vmem:[#allocation7 + $0x20] ss:$8 sps:$4 sm:$0xff]  }
  0x5b   : > { %s398_s11 = scalar_select %p397_p8, %s1366_s27, 1  ;;  %527 = vmatprep.subr.bf16.mxu0 %v1136_v1  ;;  %1035 = vmatprep.subr.bf16.mxu1 %v1136_v1  ;;  %v1142_v5 = vld [vmem:[#allocation7 + $0x14] ss:$8 sps:$4 sm:$0xff]   ;;  %v405_v7 = vld [vmem:[%s1568_s29 + $0x8] sm:$0xff]  ;;  %v1144_v10 = vld [vmem:[#allocation7 + $0x10] ss:$8 sps:$4 sm:$0xff]  }
  0x5c   : > { %528 = vmatpush1.bf16.msra.mxu0 %v1138_v2  ;;  %1039 = vmatpush1.bf16.msra.mxu1 %v1138_v2  ;;  %v404_v6 = vld [vmem:[%s1568_s29] sm:$0xff]  ;;  %v409_v14 = vld [vmem:[%s1568_s29 + $0x28] sm:$0xff]  ;;  %v406_v22 = vld [vmem:[%s1568_s29 + $0x10] sm:$0xff]  ;;  %vm506_vm0 = vcmask 523264   ;;  %v457_v40 = vshrl.u32 %v456_v39, 7  ;;  %s1603_s12 = sshll.u32 %s1564_s0, 5 }
  0x5d   : > { %529 = vmatprep.subr.bf16.mxu0 %v1139_v3  ;;  %1036 = vmatprep.subr.bf16.mxu1 %v1139_v3  ;;  %s399_s17 = scalar_lea.vmem %s1804_s2, %s398_s11  ;;  %v974_v8 = vld [vmem:[%s344_s10] ss:$0 sm:$0xff]  ;;  %v1145_v16 = vld [vmem:[#allocation7 + $0x4] ss:$8 sps:$4 sm:$0xff]   ;;  %v407_v23 = vld [vmem:[%s1568_s29 + $0x18] sm:$0xff]  ;;  %vm628_vm1 = vcmask 519168  }
  0x5e   : > { %v408_v9 = vld [vmem:[%s1568_s29 + $0x20] sm:$0xff]  ;;  %v419_v11 = vmul.f32 %v974_v8, %v404_v6  ;;  %v420_v12 = vmul.f32 %v974_v8, %v405_v7  ;;  %v424_v17 = vmul.f32 %v974_v8, %v409_v14  ;;  %v410_v25 = vld [vmem:[%s1568_s29 + $0x30] sm:$0xff]  ;;  %v411_v26 = vld [vmem:[%s1568_s29 + $0x38] sm:$0xff]  ;;  %v421_v27 = vmul.f32 %v974_v8, %v406_v22  ;;  %s1610_s14 = scalar_lea.vmem [#allocation8], %s1603_s12  ;;  %s1382_s19 = smov 64  }
  0x5f   : > { %v975_v13 = vld [vmem:[%s399_s17] ss:$0 sm:$0xff]  ;;  %v423_v15 = vmul.f32 %v974_v8, %v408_v9  ;;  %v1147_v24 = vld [vmem:[#allocation7] ss:$8 sps:$4 sm:$0xff]   ;;  %v422_v28 = vmul.f32 %v974_v8, %v407_v23  ;;  %v425_v31 = vmul.f32 %v974_v8, %v410_v25  ;;  %v426_v32 = vmul.f32 %v974_v8, %v411_v26  ;;  %s1618_s20 = scalar_lea.vmem [#allocation11], %s1603_s12  ;;  %s1644_s8 = sshll.u32 %s1366_s27, 9 }
  0x60   : > { %530 = vmatpush1.bf16.msra.mxu0 %v1141_v4  ;;  %1040 = vmatpush1.bf16.msra.mxu1 %v1141_v4  ;;  %v434_v18 = vadd.f32 %v975_v13, %v419_v11  ;;  %v435_v19 = vadd.f32 %v975_v13, %v420_v12  ;;  %v439_v21 = vadd.f32 %v975_v13, %v424_v17  ;;  %v458_v41 = vsub.s32 0, %v457_v40  ;;  %v454_v42 = vld [vmem:[%s1806_s4] sm:$0x3]  ;;  %s731_s18 = sshll.u32 %s1610_s14, 4  ;;  %s1658_s22 = scalar_lea.hbm %s1807_s5, %s1644_s8  ;;  %s1660_s18 = int_to_ptr.vmem [resolvable:$true] %s731_s18 }
  0x61   : > { %531 = vmatprep.subr.bf16.mxu0 %v1142_v5  ;;  %1037 = vmatprep.subr.bf16.mxu1 %v1142_v5  ;;  %v438_v20 = vadd.f32 %v975_v13, %v423_v15  ;;  %v436_v33 = vadd.f32 %v975_v13, %v421_v27  ;;  %v437_v34 = vadd.f32 %v975_v13, %v422_v28  ;;  %v462_v43 = vsub.s32 1, %v457_v40  ;;  %s706_s3 = scalar_lea.sflag [#allocation4], %s1564_s0  ;;  %s1230_s26 = scalar_lea.vmem %s1660_s18, 512 }
  0x62   : > { %v442_v29 = vpack.c.bf16 %v435_v19, %v434_v18  ;;  %v440_v35 = vadd.f32 %v975_v13, %v425_v31  ;;  %v441_v36 = vadd.f32 %v975_v13, %v426_v32  ;;  %v459_v44 = vrot.slane %v454_v42, %v458_v41  ;;  %p1231_p1 = scmp.ne.s32.totalorder %s1660_s18, %s1230_s26  ;;  %s1383_s29 = smov [#allocation8]  }
  0x63   : > { %v444_v30 = vpack.c.bf16 %v439_v21, %v438_v20  ;;  %v443_v37 = vpack.c.bf16 %v437_v34, %v436_v33  ;;  %v1605_v45 = vrot.slane %v454_v42, %v462_v43  ;;  %s1234_s24 = sshll.u32 %s1383_s29, 4  ;;  %s1235_s24 = int_to_ptr.vmem [resolvable:$false] %s1234_s24 }
  0x64   : > { %532 = vmatpush1.bf16.msra.mxu0 %v1144_v10  ;;  %1041 = vmatpush1.bf16.msra.mxu1 %v1144_v10  ;;  %v445_v38 = vpack.c.bf16 %v441_v36, %v440_v35  ;;  %p1232_p4 = pnand %p1231_p1, %p1515_p0  ;;  %s1236_s10 = scalar_lea.vmem %s1235_s24, 1024 }
  0x65   : > { %533 = vmatprep.subr.bf16.mxu0 %v1145_v16  ;;  %1038 = vmatprep.subr.bf16.mxu1 %v1145_v16  ;;  %p1237_p7 = scmp.lt.s32.totalorder %s1660_s18, %s1235_s24  ;;  %p1238_p2 = scmp.lt.s32.totalorder %s1236_s10, %s1230_s26 }
  0x66   : > { %p1233_p5 = pneg %p1232_p4 }
  0x67   : > { %p1239_p6 = por %p1238_p2, %p1237_p7 }
  0x68   : > { %534 = vmatpush1.bf16.msra.mxu0 %v1147_v24  ;;  %1042 = vmatpush1.bf16.msra.mxu1 %v1147_v24 }
  0x69   : > { %p1240_p9 = pnand %p1239_p6, %p1233_p5 }
  0x6b   : > { %984 = vmatmul.mubr.msk.bf16.vlgmr.msra.gmra.mxu0 %vm506_vm0, %v442_v29  ;;  %986 = vmatmul.mubr.msk.bf16.vlgmr.msra.gmra.mxu1 %vm506_vm0, %v444_v30 }
  0x6c   : > { %561 = vmatprep.mubr.bf16.mxu0 %v1381_v0  ;;  %581 = vmatprep.mubr.bf16.mxu1 %v1381_v0 }
  0x73   : > { %985 = vmatmul.mubr.msk.bf16.gmra.mxu0 %vm506_vm0, %v443_v37  ;;  %987 = vmatmul.mubr.msk.bf16.gmra.mxu1 %vm506_vm0, %v445_v38 }
 0x12b   : > { %v553_v46 = vpop.f32.mrf.mxu0  ;;  %v573_v47 = vpop.f32.mrf.mxu1 }
 0x12c   : > { %v554_v48 = vadd.f32 %v553_v46, %v459_v44  ;;  %v574_v49 = vadd.f32 %v573_v47, %v459_v44 }
 0x12d   : > { %v555_v50 = vpop.f32.mrf.mxu0  ;;  %v575_v51 = vpop.f32.mrf.mxu1 }
 0x12e   : > { %v1016_v52 = vpack.c.bf16 %v554_v48, %v554_v48  ;;  %v1020_v53 = vpack.c.bf16 %v574_v49, %v574_v49  ;;  %v556_v54 = vadd.f32 %v555_v50, %v1605_v45  ;;  %v576_v55 = vadd.f32 %v575_v51, %v1605_v45 }
 0x12f   : > { %v557_v56 = vpop.f32.mrf.mxu0  ;;  %v577_v57 = vpop.f32.mrf.mxu1 }
 0x130   : > { %629 = vst.msk [vmem:[%s1610_s14] sm:$0xf] %vm628_vm1, %v1016_v52  ;;  %633 = vst.msk [vmem:[%s1610_s14 + $0x10] sm:$0xf] %vm628_vm1, %v1020_v53  ;;  %v1024_v58 = vpack.c.bf16 %v556_v54, %v556_v54  ;;  %v1028_v59 = vpack.c.bf16 %v576_v55, %v576_v55  ;;  %v558_v60 = vadd.f32 %v557_v56, %v459_v44  ;;  %637 = vrot.lane.b32.xlu0 %v1016_v52, %s1382_s19 }
 0x131   : > { %v578_v61 = vadd.f32 %v577_v57, %v459_v44  ;;  %v559_v62 = vpop.f32.mrf.mxu0  ;;  %v579_v63 = vpop.f32.mrf.mxu1 }
 0x132   : > { %697 = vst.msk [vmem:[%s1618_s20] sm:$0xf] %vm628_vm1, %v1024_v58  ;;  %701 = vst.msk [vmem:[%s1618_s20 + $0x10] sm:$0xf] %vm628_vm1, %v1028_v59  ;;  %v1017_v0 = vpack.c.bf16 %v558_v60, %v558_v60  ;;  %v560_v2 = vadd.f32 %v559_v62, %v1605_v45  ;;  %v580_v3 = vadd.f32 %v579_v63, %v1605_v45 }
 0x133   : > { %v1021_v1 = vpack.c.bf16 %v578_v61, %v578_v61  ;;  %v563_v4 = vpop.f32.mrf.mxu0  ;;  %v583_v5 = vpop.f32.mrf.mxu1 }
 0x134   : > { %630 = vst.msk [vmem:[%s1610_s14 + $0x4] sm:$0xf] %vm628_vm1, %v1017_v0  ;;  %v1025_v6 = vpack.c.bf16 %v560_v2, %v560_v2  ;;  %v1029_v7 = vpack.c.bf16 %v580_v3, %v580_v3  ;;  %v564_v8 = vadd.f32 %v563_v4, %v459_v44  ;;  %v584_v9 = vadd.f32 %v583_v5, %v459_v44 }
 0x135   : > { %634 = vst.msk [vmem:[%s1610_s14 + $0x14] sm:$0xf] %vm628_vm1, %v1021_v1  ;;  %647 = vrot.lane.b32.xlu1 %v1021_v1, %s1382_s19  ;;  %645 = vrot.lane.b32.xlu0 %v1020_v53, %s1382_s19  ;;  %v565_v10 = vpop.f32.mrf.mxu0  ;;  %v585_v11 = vpop.f32.mrf.mxu1 }
 0x136   : > { %698 = vst.msk [vmem:[%s1618_s20 + $0x4] sm:$0xf] %vm628_vm1, %v1025_v6  ;;  %702 = vst.msk [vmem:[%s1618_s20 + $0x14] sm:$0xf] %vm628_vm1, %v1029_v7  ;;  %v1018_v12 = vpack.c.bf16 %v564_v8, %v564_v8  ;;  %v1022_v13 = vpack.c.bf16 %v584_v9, %v584_v9  ;;  %v566_v14 = vadd.f32 %v565_v10, %v1605_v45 }
 0x137   : > { %v586_v15 = vadd.f32 %v585_v11, %v1605_v45  ;;  %v567_v16 = vpop.f32.mrf.mxu0  ;;  %v587_v17 = vpop.f32.mrf.mxu1 }
 0x138   : > { %631 = vst.msk [vmem:[%s1610_s14 + $0x8] sm:$0xf] %vm628_vm1, %v1018_v12  ;;  %635 = vst.msk [vmem:[%s1610_s14 + $0x18] sm:$0xf] %vm628_vm1, %v1022_v13  ;;  %v1026_v18 = vpack.c.bf16 %v566_v14, %v566_v14  ;;  %v568_v20 = vadd.f32 %v567_v16, %v459_v44  ;;  %v588_v21 = vadd.f32 %v587_v17, %v459_v44 }
 0x139   : > { %v1030_v19 = vpack.c.bf16 %v586_v15, %v586_v15  ;;  %641 = vrot.lane.b32.xlu1 %v1018_v12, %s1382_s19  ;;  %639 = vrot.lane.b32.xlu0 %v1017_v0, %s1382_s19  ;;  %v569_v22 = vpop.f32.mrf.mxu0  ;;  %v589_v23 = vpop.f32.mrf.mxu1 }
 0x13a   : > { %699 = vst.msk [vmem:[%s1618_s20 + $0x8] sm:$0xf] %vm628_vm1, %v1026_v18  ;;  %v1019_v24 = vpack.c.bf16 %v568_v20, %v568_v20  ;;  %v1023_v25 = vpack.c.bf16 %v588_v21, %v588_v21  ;;  %v570_v26 = vadd.f32 %v569_v22, %v1605_v45  ;;  %v590_v27 = vadd.f32 %v589_v23, %v1605_v45 }
 0x13b   : > { %703 = vst.msk [vmem:[%s1618_s20 + $0x18] sm:$0xf] %vm628_vm1, %v1030_v19 }
 0x13c   : > { %632 = vst.msk [vmem:[%s1610_s14 + $0xc] sm:$0xf] %vm628_vm1, %v1019_v24  ;;  %636 = vst.msk [vmem:[%s1610_s14 + $0x1c] sm:$0xf] %vm628_vm1, %v1023_v25  ;;  %v1027_v28 = vpack.c.bf16 %v570_v26, %v570_v26  ;;  %v1031_v29 = vpack.c.bf16 %v590_v27, %v590_v27 }
 0x13d   : > { %643 = vrot.lane.b32.xlu1 %v1019_v24, %s1382_s19  ;;  %649 = vrot.lane.b32.xlu0 %v1022_v13, %s1382_s19 }
 0x13e   : > { %700 = vst.msk [vmem:[%s1618_s20 + $0xc] sm:$0xf] %vm628_vm1, %v1027_v28  ;;  %704 = vst.msk [vmem:[%s1618_s20 + $0x1c] sm:$0xf] %vm628_vm1, %v1031_v29 }
 0x13f   : > { %1243 = shalt.err (!%p1240_p9)
}
 0x140   : > { %s1244_s11 = scalar_lea.hbm %s1658_s22, 512  ;;  %s1248_s17 = scalar_lea.hbm %s1807_s5, 1024 }
 0x141   : > { %p1245_p12 = scmp.ne.s32.totalorder %s1658_s22, %s1244_s11  ;;  %p1249_p3 = scmp.lt.s32.totalorder %s1658_s22, %s1807_s5 }
 0x142   : > { %p1250_p8 = scmp.lt.s32.totalorder %s1248_s17, %s1244_s11 }
 0x143   : > { %p1246_p13 = pnand %p1245_p12, %p1515_p0 }
 0x144   : > { %p1251_p1 = por %p1250_p8, %p1249_p3 }
 0x145   : > { %p1247_p11 = pneg %p1246_p13 }
 0x147   : > { %p1252_p4 = pnand %p1251_p1, %p1247_p11 }
 0x149   : > { %1255 = shalt.err (!%p1252_p4)
}
 0x14a   : > { %s1384_s14 = smov 4   ;;  %651 = vrot.lane.b32.xlu1 %v1023_v25, %s1382_s19  ;;  %s388_s27 = scalar_lea.vmem [#allocation9], %s1603_s12 }
 0x14b   : > { %1051 = dma.vmem_to_hbm [thread:$0]  (%p1515_p0), %s1660_s18, 512, %s1658_s22, %s706_s3, %s1382_s19, %s1382_s19, %s1384_s14  }
 0x14c   : > { %s749_s0 = sshll.u32 %s388_s27, 4  ;;  %s767_s12 = sshll.u32 %s1618_s20, 4  ;;  %s1707_s0 = int_to_ptr.vmem [resolvable:$true] %s749_s0  ;;  %s1716_s12 = int_to_ptr.vmem [resolvable:$true] %s767_s12 }
 0x14d   : > { %s1714_s22 = scalar_lea.hbm %s1808_s6, %s1644_s8  ;;  %s1841_s26 = sld [smem:[#allocation25_spill]] }
 0x14e   : > { %s1727_s24 = scalar_lea.sflag [#allocation10], %s341_s7  ;;  %s1256_s11 = scalar_lea.vmem %s1707_s0, 512 }
 0x14f   : > { %p1257_p5 = scmp.ne.s32.totalorder %s1707_s0, %s1256_s11  ;;  %s1385_s9 = smov [#allocation9]  }
 0x150   : > { %s1260_s15 = sshll.u32 %s1385_s9, 4  ;;  %s1261_s15 = int_to_ptr.vmem [resolvable:$false] %s1260_s15 }
 0x151   : > { %p1258_p7 = pnand %p1257_p5, %p1515_p0  ;;  %s1262_s17 = scalar_lea.vmem %s1261_s15, 1024 }
 0x152   : > { %p1263_p6 = scmp.lt.s32.totalorder %s1707_s0, %s1261_s15  ;;  %p1264_p9 = scmp.lt.s32.totalorder %s1262_s17, %s1256_s11 }
 0x153   : > { %s1842_s10 = smov %s1841_s26  ;;  %s1722_s29 = scalar_lea.hbm %s1841_s26, %s1644_s8 }
 0x154   : > { %p1259_p2 = pneg %p1258_p7  ;;  %p1265_p12 = por %p1264_p9, %p1263_p6 }
 0x156   : > { %p1266_p13 = pnand %p1265_p12, %p1259_p2 }
 0x1a2   : > { %v638_v30 = vpop.permute.xlu0 %637 }
 0x1a3   : > { %661 = vst.msk [vmem:[%s388_s27] sm:$0xf] %vm628_vm1, %v638_v30 }
 0x1a7   : > { %v648_v31 = vpop.permute.xlu1 %647  ;;  %v646_v32 = vpop.permute.xlu0 %645 }
 0x1a8   : > { %666 = vst.msk [vmem:[%s388_s27 + $0x14] sm:$0xf] %vm628_vm1, %v648_v31  ;;  %665 = vst.msk [vmem:[%s388_s27 + $0x10] sm:$0xf] %vm628_vm1, %v646_v32 }
 0x1ab   : > { %v642_v33 = vpop.permute.xlu1 %641  ;;  %v640_v34 = vpop.permute.xlu0 %639 }
 0x1ac   : > { %663 = vst.msk [vmem:[%s388_s27 + $0x8] sm:$0xf] %vm628_vm1, %v642_v33  ;;  %662 = vst.msk [vmem:[%s388_s27 + $0x4] sm:$0xf] %vm628_vm1, %v640_v34 }
 0x1af   : > { %v644_v35 = vpop.permute.xlu1 %643  ;;  %v650_v36 = vpop.permute.xlu0 %649 }
 0x1b0   : > { %664 = vst.msk [vmem:[%s388_s27 + $0xc] sm:$0xf] %vm628_vm1, %v644_v35  ;;  %667 = vst.msk [vmem:[%s388_s27 + $0x18] sm:$0xf] %vm628_vm1, %v650_v36 }
 0x1bc   : > { %v652_v37 = vpop.permute.xlu1 %651 }
 0x1bd   : > { %668 = vst.msk [vmem:[%s388_s27 + $0x1c] sm:$0xf] %vm628_vm1, %v652_v37 }
 0x1be   : > { %1269 = shalt.err (!%p1266_p13)
}
 0x1bf   : > { %s1270_s30 = scalar_lea.hbm %s1714_s22, 512  ;;  %s1274_s13 = scalar_lea.hbm %s1808_s6, 1024 }
 0x1c0   : > { %p1271_p11 = scmp.ne.s32.totalorder %s1714_s22, %s1270_s30  ;;  %p1275_p1 = scmp.lt.s32.totalorder %s1714_s22, %s1808_s6 }
 0x1c1   : > { %p1276_p4 = scmp.lt.s32.totalorder %s1274_s13, %s1270_s30 }
 0x1c2   : > { %p1272_p3 = pnand %p1271_p11, %p1515_p0 }
 0x1c3   : > { %p1277_p5 = por %p1276_p4, %p1275_p1 }
 0x1c4   : > { %p1273_p8 = pneg %p1272_p3 }
 0x1c6   : > { %p1278_p7 = pnand %p1277_p5, %p1273_p8 }
 0x1c8   : > { %1281 = shalt.err (!%p1278_p7)
}
 0x1c9   : > { %1052 = dma.vmem_to_hbm [thread:$0]  (%p1515_p0), %s1707_s0, 512, %s1714_s22, %s1727_s24, %s1382_s19, %s1382_s19, %s1384_s14  }
 0x1ca   : > { %s1282_s18 = scalar_lea.vmem %s1716_s12, 512  ;;  %s1386_s21 = smov [#allocation11]  }
 0x1cb   : > { %p1283_p2 = scmp.ne.s32.totalorder %s1716_s12, %s1282_s18  ;;  %s1286_s3 = sshll.u32 %s1386_s21, 4  ;;  %s1287_s3 = int_to_ptr.vmem [resolvable:$false] %s1286_s3 }
 0x1cc   : > { %s1288_s20 = scalar_lea.vmem %s1287_s3, 1024  ;;  %p1289_p12 = scmp.lt.s32.totalorder %s1716_s12, %s1287_s3 }
 0x1cd   : > { %p1284_p6 = pnand %p1283_p2, %p1515_p0  ;;  %p1290_p13 = scmp.lt.s32.totalorder %s1288_s20, %s1282_s18 }
 0x1cf   : > { %p1285_p9 = pneg %p1284_p6  ;;  %p1291_p11 = por %p1290_p13, %p1289_p12 }
 0x1d1   : > { %p1292_p3 = pnand %p1291_p11, %p1285_p9 }
 0x1d3   : > { %1295 = shalt.err (!%p1292_p3)
}
 0x1d4   : > { %s1296_s26 = scalar_lea.hbm %s1722_s29, 512  ;;  %s1300_s11 = scalar_lea.hbm %s1842_s10, 1024 }
 0x1d5   : > { %p1297_p8 = scmp.ne.s32.totalorder %s1722_s29, %s1296_s26  ;;  %p1301_p5 = scmp.lt.s32.totalorder %s1722_s29, %s1842_s10 }
 0x1d6   : > { %p1302_p7 = scmp.lt.s32.totalorder %s1300_s11, %s1296_s26 }
 0x1d7   : > { %p1298_p1 = pnand %p1297_p8, %p1515_p0 }
 0x1d8   : > { %p1303_p2 = por %p1302_p7, %p1301_p5 }
 0x1d9   : > { %p1299_p4 = pneg %p1298_p1 }
 0x1db   : > { %p1304_p6 = pnand %p1303_p2, %p1299_p4 }
 0x1dd   : > { %1307 = shalt.err (!%p1304_p6)
}
 0x1de   : > { %1053 = dma.vmem_to_hbm [thread:$0]  (%p1515_p0), %s1716_s12, 512, %s1722_s29, %s1727_s24, %s1382_s19, %s1382_s19, %s1384_s14  }
 0x1df PF: > { %s1843_s17 = sld [smem:[#allocation17_spill]] }
 0x1e0   : > { %s1844_s30 = sld [smem:[#allocation20_spill]] }
 0x1e1   : > { %s1845_s7 = sld [smem:[#allocation19_spill]] }
 0x1e5   : > { %s782_s8 = sand.u32 1, %s1843_s17  }
 0x1e6   : > { %p1846_p9 = scmp.ne.s32.totalorder %s1844_s30, 0  ;;  %s783_s13 = scalar_lea.sflag [#allocation4], %s782_s8 }
 0x1e8   : > { %p1069_p12 = pnand %p963_p10, %p1846_p9 }
 0x1ea   : > { %p1070_p13 = pneg %p1069_p12 }
 0x1ec   : > { %1345 = dma.done.wait (%p1070_p13), %s783_s13, 512  }
 0x1ed   : > { %1347 = vsyncadd (%p1070_p13), %s783_s13, 4294966784  ;;  %s1847_s23 = sadd.s32 4294967294, %s1845_s7  }
 0x1ee   : > { %s791_s16 = sand.u32 1, %s1847_s23  }
 0x1ef   : > { %s792_s27 = scalar_lea.sflag [#allocation10], %s791_s16 }
 0x1f0   : > { %1349 = dma.done.wait (%p1070_p13), %s792_s27, 1024  }
 0x1f1   : > { %1351 = vsyncadd (%p1070_p13), %s792_s27, 4294966272  ;;  %s30_s29 = sadd.s32 1, %s1845_s7   ;;  %s1848_s19 = sld [smem:[#allocation18_spill]] }
 0x1f2   : > { %p27_p0 = scmp.ge.s32.totalorder %s30_s29, 4   ;;  %s1849_s26 = sld [smem:[#allocation22_spill]] }
 0x1f3   : > { %s1850_s14 = sld [smem:[#allocation21_spill]]  ;;  %s1851_s24 = smov %s1358_s25 }
 0x1f4   : > { %s1853_s27 = smov %s1370_s28 }
 0x1f5   :  { %29 = sbr.rel (!%p27_p0) target bundleno = 14 (0xe), region = 137 }
 0x1f7   : > { %s1852_s25 = smov %s1848_s19 }
 0x1f9   : > { %s1854_s28 = smov %s1850_s14 }
 0x1fa   :  { %806 = vsyncpa [#allocation3], 1 }
 0x1fb   :  { %808 = vsyncpa [#allocation3 + $0x1], 1 }
 0x1fc   :  { %809 = vsyncpa [#allocation6], 1 }
 0x1fd   :  { %811 = vsyncpa [#allocation6 + $0x1], 1 }
 0x1fe   :  { %812 = vsyncpa [#allocation4], 1 }
 0x1ff   :  { %814 = vsyncpa [#allocation4 + $0x1], 1 }
 0x200   :  { %815 = vsyncpa [#allocation10], 1 }
 0x201   :  { %817 = vsyncpa [#allocation10 + $0x1], 1 }

</bundles_post_ra>
